<compile_context>
chip_gen: v7x
topology: tpu7x:2x2x1
jax: 0.10.0
libtpu: 0.0.40
codegen_flags: <defaults>
</compile_context>

<pallas_src>
import math
import functools

import jax
import jax.numpy as jnp
from jax.experimental import pallas as pl
from jax.experimental.pallas import tpu as pltpu


def _round_up(n, m):
    return ((n + m - 1) // m) * m


def _vmem_limit_bytes(default=64 * 1024 * 1024):
    # ~96 MiB on v5e/v6e (128 MiB physical), ~48 MiB on v7x (64 MiB physical).
    try:
        cap = int(pltpu.get_tpu_info().vmem_capacity_bytes)
        return min(96 * 1024 * 1024, (cap * 3) // 4)
    except Exception:
        return default


# --------------------------------------------------------------------------
# Kernels
# --------------------------------------------------------------------------

def _qkv_proj_kernel(x_ref, w_ref, q_ref, k_ref, v_ref):
    """Fused Q/K/V projection for one (batch, row-tile) block.

    w_ref is the host-fused (E, 3E) weight [Wq^T*scale | Wk^T | Wv^T]: one long
    MXU stream instead of three, one resident (double-buffered) weight, and the
    1/sqrt(head_dim) softmax scale is pre-folded into the Q columns.
    """
    x = x_ref[0]                                                    # (tm, E)
    xw = jnp.dot(x.astype(w_ref.dtype), w_ref[...],
                 preferred_element_type=jnp.float32)                # (tm, 3E)
    e = q_ref.shape[-1]
    q_ref[0] = xw[:, :e].astype(q_ref.dtype)
    k_ref[0] = xw[:, e:2 * e].astype(k_ref.dtype)
    v_ref[0] = xw[:, 2 * e:].astype(v_ref.dtype)


def _attn_update(q_ref, k_ref, v_ref, mask_ref, m_sc, l_sc, acc_sc,
                 *, heads, head_dim):
    """Online-softmax update for one kv tile.

    Q/K/V arrive merged along the feature axis (lane-dense (tq, E) blocks);
    heads are split here with static lane slices, so in-flight score/prob
    intermediates are only (tq, tk) per head.
    """
    ki = pl.program_id(2)

    @pl.when(ki == 0)
    def _init():
        m_sc[...] = jnp.full(m_sc.shape, -jnp.inf, m_sc.dtype)
        l_sc[...] = jnp.zeros(l_sc.shape, l_sc.dtype)
        acc_sc[...] = jnp.zeros(acc_sc.shape, acc_sc.dtype)

    # Additive finite mask bias (mask==1 -> -1e30): one VPU add per head,
    # no NaNs even for fully-masked rows.  Shared across heads.
    bias = mask_ref[0].astype(jnp.float32) * jnp.float32(-1e30)     # (tq, tk)

    for h in range(heads):
        lo = h * head_dim
        hi = lo + head_dim
        q_h = q_ref[0, :, lo:hi]                                    # (tq, D), pre-scaled
        k_h = k_ref[0, :, lo:hi]                                    # (tk, D)
        v_h = v_ref[0, :, lo:hi]                                    # (tk, D)

        s = jnp.einsum("qd,kd->qk", q_h, k_h,
                       preferred_element_type=jnp.float32) + bias   # (tq, tk)

        m_prev = m_sc[h]                                            # (tq, 1)
        m_new = jnp.maximum(m_prev, jnp.max(s, axis=-1, keepdims=True))
        alpha = jnp.exp(m_prev - m_new)
        p = jnp.exp(s - m_new)                                      # (tq, tk)
        l_sc[h] = alpha * l_sc[h] + jnp.sum(p, axis=-1, keepdims=True)
        acc_sc[h] = alpha * acc_sc[h] + jnp.dot(
            p.astype(v_h.dtype), v_h, preferred_element_type=jnp.float32)
        m_sc[h] = m_new


def _attn_kernel_fused(q_ref, k_ref, v_ref, mask_ref, wo_ref, bo_ref, o_ref,
                       m_sc, l_sc, acc_sc, *, heads, head_dim):
    """Flash attention with fc_out fused into the finalize (Wo resident)."""
    _attn_update(q_ref, k_ref, v_ref, mask_ref, m_sc, l_sc, acc_sc,
                 heads=heads, head_dim=head_dim)

    @pl.when(pl.program_id(2) == pl.num_programs(2) - 1)
    def _finalize():
        y = None
        for h in range(heads):
            ctx_h = acc_sc[h] * pl.reciprocal(l_sc[h], approx=False)  # (tq, D)
            part = jnp.dot(ctx_h.astype(wo_ref.dtype),
                           wo_ref[h * head_dim:(h + 1) * head_dim, :],
                           preferred_element_type=jnp.float32)        # (tq, E)
            y = part if y is None else y + part
        o_ref[0] = (y + bo_ref[...]).astype(o_ref.dtype)


def _attn_kernel(q_ref, k_ref, v_ref, mask_ref, o_ref, m_sc, l_sc, acc_sc,
                 *, heads, head_dim):
    """Flash attention writing merged-head (B, S, E) context (fc_out separate;
    used when Wo is too large to keep resident in VMEM)."""
    _attn_update(q_ref, k_ref, v_ref, mask_ref, m_sc, l_sc, acc_sc,
                 heads=heads, head_dim=head_dim)

    @pl.when(pl.program_id(2) == pl.num_programs(2) - 1)
    def _finalize():
        for h in range(heads):
            ctx_h = acc_sc[h] * pl.reciprocal(l_sc[h], approx=False)
            o_ref[0, :, h * head_dim:(h + 1) * head_dim] = ctx_h.astype(o_ref.dtype)


def _out_proj_kernel(ctx_ref, wo_ref, bo_ref, o_ref):
    y = jnp.dot(ctx_ref[0].astype(wo_ref.dtype), wo_ref[...],
                preferred_element_type=jnp.float32) + bo_ref[...]
    o_ref[0] = y.astype(o_ref.dtype)


# --------------------------------------------------------------------------
# Wrapper
# --------------------------------------------------------------------------

def self_attention(x, mask, wq, wk, wv, wo, bo, *, heads,
                   q_tile=256, kv_tile=256, row_tile=256,
                   mxu_dtype=jnp.float32, fuse_out=None):
    """x: (B, S, E), mask: (B, S, S) with 1 == masked.  Returns (B, S, E).

    Weights follow PyTorch nn.Linear convention: W is (out, in), y = x @ W.T + b.
    mxu_dtype=jnp.bfloat16 is the recommended production setting on v6e/v7x
    (all accumulation and softmax math stays f32); the f32 default keeps
    bit-tight accuracy.  Tiles of 256 suit all generations; drop to 128 on v7x
    for very large E so double-buffered blocks stay inside its 64 MiB VMEM.
    """
    B, S, E = x.shape
    D = E // heads
    assert D * heads == E, "embed_size must be divisible by heads"
    scale = 1.0 / math.sqrt(D)

    # --- tiling: single full-extent tile for small S, pad-to-tile otherwise ---
    max_tile = max(q_tile, kv_tile, row_tile)
    if S <= max_tile:
        tq = tk = tm = Sp = S
    else:
        tq, tk, tm = q_tile, kv_tile, row_tile
        for t in (tq, tk, tm):
            assert max_tile % t == 0, "tiles must divide the largest tile (use powers of two)"
        Sp = _round_up(S, max_tile)

    # --- host-side one-time prep (layout plumbing only) ------------------------
    w_qkv_t = jnp.concatenate([wq.T * scale, wk.T, wv.T], axis=1).astype(mxu_dtype)
    wo_t = wo.T.astype(mxu_dtype)
    bo2 = bo.reshape(1, E).astype(jnp.float32)
    mask_i8 = (mask != 0).astype(jnp.int8)            # 4x less HBM/DMA than int32

    if Sp != S:                                       # pad seq to a tile multiple
        x = jnp.pad(x, ((0, 0), (0, Sp - S), (0, 0)))
        mask_i8 = jnp.pad(mask_i8, ((0, 0), (0, Sp - S), (0, Sp - S)),
                          constant_values=1)          # padded keys are masked

    if fuse_out is None:                              # keep Wo resident only if small
        fuse_out = E * E * jnp.dtype(mxu_dtype).itemsize <= 16 * 1024 * 1024

    vmem = _vmem_limit_bytes()
    cp2 = pltpu.CompilerParams(dimension_semantics=("parallel", "parallel"),
                               vmem_limit_bytes=vmem)
    cp3 = pltpu.CompilerParams(
        dimension_semantics=("parallel", "parallel", "arbitrary"),
        vmem_limit_bytes=vmem)

    # ---- 1) fused Q/K/V projection, row-tiled ---------------------------------
    q, k, v = pl.pallas_call(
        _qkv_proj_kernel,
        out_shape=tuple(jax.ShapeDtypeStruct((B, Sp, E), mxu_dtype) for _ in range(3)),
        grid_spec=pltpu.PrefetchScalarGridSpec(
            num_scalar_prefetch=0,
            grid=(B, Sp // tm),
            in_specs=[
                pl.BlockSpec((1, tm, E), lambda b, i: (b, i, 0)),    # x
                pl.BlockSpec((E, 3 * E), lambda b, i: (0, 0)),       # [Wq^T*s|Wk^T|Wv^T]
            ],
            out_specs=tuple(pl.BlockSpec((1, tm, E), lambda b, i: (b, i, 0))
                            for _ in range(3)),
        ),
        compiler_params=cp2,
    )(x, w_qkv_t)

    # ---- 2) flash attention: grid (B, q_tiles, kv_tiles), kv axis reduces -----
    attn_scratch = [
        pltpu.VMEM((heads, tq, 1), jnp.float32),   # running max m
        pltpu.VMEM((heads, tq, 1), jnp.float32),   # running sum l
        pltpu.VMEM((heads, tq, D), jnp.float32),   # context accumulator
    ]
    qkv_specs = [
        pl.BlockSpec((1, tq, E), lambda b, qi, ki: (b, qi, 0)),      # Q
        pl.BlockSpec((1, tk, E), lambda b, qi, ki: (b, ki, 0)),      # K
        pl.BlockSpec((1, tk, E), lambda b, qi, ki: (b, ki, 0)),      # V
        pl.BlockSpec((1, tq, tk), lambda b, qi, ki: (b, qi, ki)),    # mask (int8)
    ]
    out_spec = pl.BlockSpec((1, tq, E), lambda b, qi, ki: (b, qi, 0))

    if fuse_out:
        out = pl.pallas_call(
            functools.partial(_attn_kernel_fused, heads=heads, head_dim=D),
            out_shape=jax.ShapeDtypeStruct((B, Sp, E), x.dtype),
            grid_spec=pltpu.PrefetchScalarGridSpec(
                num_scalar_prefetch=0,
                grid=(B, Sp // tq, Sp // tk),
                in_specs=qkv_specs + [
                    pl.BlockSpec((E, E), lambda b, qi, ki: (0, 0)),  # Wo^T (resident)
                    pl.BlockSpec((1, E), lambda b, qi, ki: (0, 0)),  # bias
                ],
                out_specs=out_spec,
                scratch_shapes=attn_scratch,
            ),
            compiler_params=cp3,
        )(q, k, v, mask_i8, wo_t, bo2)
    else:
        ctx = pl.pallas_call(
            functools.partial(_attn_kernel, heads=heads, head_dim=D),
            out_shape=jax.ShapeDtypeStruct((B, Sp, E), mxu_dtype),
            grid_spec=pltpu.PrefetchScalarGridSpec(
                num_scalar_prefetch=0,
                grid=(B, Sp // tq, Sp // tk),
                in_specs=qkv_specs,
                out_specs=out_spec,
                scratch_shapes=attn_scratch,
            ),
            compiler_params=cp3,
        )(q, k, v, mask_i8)

        # ---- 3) separate output projection (large-E fallback) -----------------
        out = pl.pallas_call(
            _out_proj_kernel,
            out_shape=jax.ShapeDtypeStruct((B, Sp, E), x.dtype),
            grid_spec=pltpu.PrefetchScalarGridSpec(
                num_scalar_prefetch=0,
                grid=(B, Sp // tm),
                in_specs=[
                    pl.BlockSpec((1, tm, E), lambda b, i: (b, i, 0)),
                    pl.BlockSpec((E, E), lambda b, i: (0, 0)),
                    pl.BlockSpec((1, E), lambda b, i: (0, 0)),
                ],
                out_specs=pl.BlockSpec((1, tm, E), lambda b, i: (b, i, 0)),
            ),
            compiler_params=cp2,
        )(ctx, wo_t, bo2)

    return out[:, :S, :] if Sp != S else out


# --------------------------------------------------------------------------
# Pure-JAX reference (mirrors the PyTorch forward, eval mode)
# --------------------------------------------------------------------------

def _reference(x, mask, wq, wk, wv, wo, bo, *, heads):
    B, S, E = x.shape
    D = E // heads
    q = (x @ wq.T).reshape(B, S, heads, D).transpose(0, 2, 1, 3)
    k = (x @ wk.T).reshape(B, S, heads, D).transpose(0, 2, 1, 3)
    v = (x @ wv.T).reshape(B, S, heads, D).transpose(0, 2, 1, 3)
    scores = jnp.einsum("bhqd,bhkd->bhqk", q, k) / math.sqrt(D)
    scores = jnp.where(mask[:, None, :, :] == 1, -jnp.inf, scores)
    attn = jax.nn.softmax(scores, axis=-1)
    ctx = jnp.einsum("bhqk,bhkd->bhqd", attn, v)
    ctx = ctx.transpose(0, 2, 1, 3).reshape(B, S, E)
    return ctx @ wo.T + bo


if __name__ == "__main__":
    def _run_case(key, B, S, E, H, masked_from, **kw):
        kx, kq, kk, kv, ko, kb = jax.random.split(key, 6)
        x = jax.random.normal(kx, (B, S, E), dtype=jnp.float32)
        bound = 1.0 / math.sqrt(E)
        wq = jax.random.uniform(kq, (E, E), jnp.float32, -bound, bound)
        wk = jax.random.uniform(kk, (E, E), jnp.float32, -bound, bound)
        wv = jax.random.uniform(kv, (E, E), jnp.float32, -bound, bound)
        wo = jax.random.uniform(ko, (E, E), jnp.float32, -bound, bound)
        bo = jax.random.uniform(kb, (E,), jnp.float32, -bound, bound)
        # Padding-style mask: keys >= masked_from are masked out (1 == masked).
        mask = jnp.zeros((B, S, S), dtype=jnp.int32).at[:, :, masked_from:].set(1)

        out = jax.block_until_ready(
            self_attention(x, mask, wq, wk, wv, wo, bo, heads=H, **kw))
        ref = _reference(x, mask, wq, wk, wv, wo, bo, heads=H)
        assert out.shape == (B, S, E)
        err = float(jnp.max(jnp.abs(out - ref)))
        assert err < 1e-3, err

    k1, k2, k3 = jax.random.split(jax.random.PRNGKey(0), 3)
    _run_case(k1, 2, 8, 32, 4, 6)                    # small S: single-tile, fused fc_out
    _run_case(k2, 2, 8, 32, 4, 6, fuse_out=False)    # separate fc_out (large-E) path
    _run_case(k3, 2, 300, 32, 4, 280)                # S > tile: pad-to-tile, multi kv-tile
    print("KERNEL_OK")
</pallas_src>

<mosaic_0001>
module attributes {stable_mosaic.version = 11 : i64} {
  func.func @_qkv_proj_kernel(%arg0: i32, %arg1: i32, %arg2: memref<1x8x32xf32, #tpu.memory_space<vmem>>, %arg3: memref<32x96xf32, #tpu.memory_space<vmem>>, %arg4: memref<1x8x32xf32, #tpu.memory_space<vmem>>, %arg5: memref<1x8x32xf32, #tpu.memory_space<vmem>>, %arg6: memref<1x8x32xf32, #tpu.memory_space<vmem>>) attributes {dimension_semantics = [#tpu.dimension_semantics<parallel>, #tpu.dimension_semantics<parallel>], iteration_bounds = array<i64: 2, 1>, scalar_prefetch = 0 : i64, scratch_operands = 0 : i64, tpu.core_type = #tpu.core_type<tc>, window_params = [{transform_indices = @transform_0, window_bounds = array<i64: 1, 8, 32>}, {pipeline_mode = #tpu.pipeline_mode<synchronous>, transform_indices = @transform_1, window_bounds = array<i64: 32, 96>}, {transform_indices = @transform_2, window_bounds = array<i64: 1, 8, 32>}, {transform_indices = @transform_3, window_bounds = array<i64: 1, 8, 32>}, {transform_indices = @transform_4, window_bounds = array<i64: 1, 8, 32>}]} {
    %c0 = arith.constant 0 : index
    %c0_0 = arith.constant 0 : index
    %c0_1 = arith.constant 0 : index
    %0 = vector.load %arg2[%c0, %c0_0, %c0_1] : memref<1x8x32xf32, #tpu.memory_space<vmem>>, vector<1x8x32xf32>
    %1 = vector.shape_cast %0 : vector<1x8x32xf32> to vector<8x32xf32>
    %c0_2 = arith.constant 0 : index
    %c0_3 = arith.constant 0 : index
    %2 = vector.load %arg3[%c0_2, %c0_3] : memref<32x96xf32, #tpu.memory_space<vmem>>, vector<32x96xf32>
    %cst = arith.constant dense<0.000000e+00> : vector<8x96xf32>
    %3 = tpu.matmul %1, %2, %cst {dimension_numbers = #tpu.dot_dimension_numbers<[1], [0], [0], [1], [0, 0, 1, 1], [], []>} : vector<8x32xf32>, vector<32x96xf32>, vector<8x96xf32> -> vector<8x96xf32>
    %4 = vector.extract_strided_slice %3 {offsets = [0, 0], sizes = [8, 32], strides = [1, 1]} : vector<8x96xf32> to vector<8x32xf32>
    %c0_4 = arith.constant 0 : index
    %c0_5 = arith.constant 0 : index
    %c0_6 = arith.constant 0 : index
    %5 = vector.load %arg4[%c0_4, %c0_5, %c0_6] : memref<1x8x32xf32, #tpu.memory_space<vmem>>, vector<1x8x32xf32>
    %6 = vector.shape_cast %5 : vector<1x8x32xf32> to vector<8x32xf32>
    %7 = vector.shape_cast %4 : vector<8x32xf32> to vector<1x8x32xf32>
    tpu.vector_store %arg4[%c0_4, %c0_5, %c0_6], %7 {strides = array<i32>} : memref<1x8x32xf32, #tpu.memory_space<vmem>>, vector<1x8x32xf32>,
    %8 = vector.extract_strided_slice %3 {offsets = [0, 32], sizes = [8, 32], strides = [1, 1]} : vector<8x96xf32> to vector<8x32xf32>
    %c0_7 = arith.constant 0 : index
    %c0_8 = arith.constant 0 : index
    %c0_9 = arith.constant 0 : index
    %9 = vector.load %arg5[%c0_7, %c0_8, %c0_9] : memref<1x8x32xf32, #tpu.memory_space<vmem>>, vector<1x8x32xf32>
    %10 = vector.shape_cast %9 : vector<1x8x32xf32> to vector<8x32xf32>
    %11 = vector.shape_cast %8 : vector<8x32xf32> to vector<1x8x32xf32>
    tpu.vector_store %arg5[%c0_7, %c0_8, %c0_9], %11 {strides = array<i32>} : memref<1x8x32xf32, #tpu.memory_space<vmem>>, vector<1x8x32xf32>,
    %12 = vector.extract_strided_slice %3 {offsets = [0, 64], sizes = [8, 32], strides = [1, 1]} : vector<8x96xf32> to vector<8x32xf32>
    %c0_10 = arith.constant 0 : index
    %c0_11 = arith.constant 0 : index
    %c0_12 = arith.constant 0 : index
    %13 = vector.load %arg6[%c0_10, %c0_11, %c0_12] : memref<1x8x32xf32, #tpu.memory_space<vmem>>, vector<1x8x32xf32>
    %14 = vector.shape_cast %13 : vector<1x8x32xf32> to vector<8x32xf32>
    %15 = vector.shape_cast %12 : vector<8x32xf32> to vector<1x8x32xf32>
    tpu.vector_store %arg6[%c0_10, %c0_11, %c0_12], %15 {strides = array<i32>} : memref<1x8x32xf32, #tpu.memory_space<vmem>>, vector<1x8x32xf32>,
    return
  }
  func.func @transform_0(%arg0: i32, %arg1: i32) -> (i32, i32, i32) {
    %c0_i32 = arith.constant 0 : i32
    %c0_i32_0 = arith.constant 0 : i32
    return %arg0, %arg1, %c0_i32 : i32, i32, i32
  }
  func.func @transform_1(%arg0: i32, %arg1: i32) -> (i32, i32) {
    %c0_i32 = arith.constant 0 : i32
    %c0_i32_0 = arith.constant 0 : i32
    %c0_i32_1 = arith.constant 0 : i32
    return %c0_i32, %c0_i32_0 : i32, i32
  }
  func.func @transform_2(%arg0: i32, %arg1: i32) -> (i32, i32, i32) {
    %c0_i32 = arith.constant 0 : i32
    %c0_i32_0 = arith.constant 0 : i32
    return %arg0, %arg1, %c0_i32 : i32, i32, i32
  }
  func.func @transform_3(%arg0: i32, %arg1: i32) -> (i32, i32, i32) {
    %c0_i32 = arith.constant 0 : i32
    %c0_i32_0 = arith.constant 0 : i32
    return %arg0, %arg1, %c0_i32 : i32, i32, i32
  }
  func.func @transform_4(%arg0: i32, %arg1: i32) -> (i32, i32, i32) {
    %c0_i32 = arith.constant 0 : i32
    %c0_i32_0 = arith.constant 0 : i32
    return %arg0, %arg1, %c0_i32 : i32, i32, i32
  }
}

</mosaic_0001>

<bundles_post_ra>
// kernel: tpu_custom_call.1
= control target key start
LH: loop header
LB: loop body
LE: loop exit
PB: predicated region body
PF: predicated region fallthrough
CT: control target
= control target key end

     0   :  { %10 = vsyncpa [#allocation3], 0  ;;  %s1236_s0 = inlined_call_operand.hbm [shape: f32[2,8,32], index: 0, kind: input, shape index: {}]   ;;  %s1237_s1 = inlined_call_operand.hbm [shape: f32[32,96], index: 1, kind: input, shape index: {}]   ;;  %s1238_s2 = inlined_call_operand.hbm [shape: f32[2,8,32], index: 2, kind: output, shape index: {0}]   ;;  %s1239_s3 = inlined_call_operand.hbm [shape: f32[2,8,32], index: 3, kind: output, shape index: {1}]   ;;  %s1240_s4 = inlined_call_operand.hbm [shape: f32[2,8,32], index: 4, kind: output, shape index: {2}]  }
   0x1   :  { %12 = vsyncpa [#allocation3 + $0x1], 0 }
   0x2   :  { %13 = vsyncpa [#allocation6], 0 }
   0x3   :  { %14 = vsyncpa [#allocation4], 0 }
   0x4   :  { %16 = vsyncpa [#allocation4 + $0x1], 0 }
   0x5   :  { %17 = vsyncpa [#allocation9], 0 }
   0x6   :  { %19 = vsyncpa [#allocation9 + $0x1], 0  ;;  %s939_s15 = smov 0   ;;  %s941_s16 = smov 0  }
   0x7   :  { %s943_s17 = smov 0   ;;  %s945_s18 = smov 0  }
   0x8   :  { %s947_s19 = smov 0   ;;  %s949_s20 = smov 0  }
   0x9 LB: > { %s970_s21 = sadd.s32 4294967295, %s900_s20   ;;  %s563_s22 = sadd.s32 4294967294, %s900_s20   ;;  %s900_s20 = sphi %s949_s20, %s25_s20   ;;  %s896_s19 = sphi %s947_s19, %s1262_s19   ;;  %s892_s18 = sphi %s945_s18, %s1261_s18   ;;  %s888_s17 = sphi %s943_s17, %s1260_s17   ;;  %s884_s16 = sphi %s941_s16, %s1259_s16   ;;  %s880_s15 = sphi %s939_s15, %s1258_s15  }
   0xa   : > { %p59_p0 = scmp.ne.s32.totalorder %s884_s16, %s880_s15  ;;  %p1241_p1 = scmp.eq.s32.totalorder %s970_s21, 0 }
   0xb   : > { %p112_p3 = scmp.eq.s32.totalorder %s563_s22, 1  ;;  %p564_p5 = scmp.ge.s32.totalorder %s900_s20, 1 }
   0xc   : > { %p981_p4 = por %p1241_p1, %p59_p0  ;;  %p175_p7 = scmp.lt.s32.totalorder %s900_s20, 3 }
   0xd   : > { %p986_p6 = por %p112_p3, %p59_p0  ;;  %s902_s26 = smov [#allocation5]  }
   0xe   : > { %s1244_s23 = scalar_select %p981_p4, 1, 0 }
   0xf   : > { %s1245_s24 = scalar_select %p986_p6, 1, 0 }
  0x10   : > { %p991_p8 = pnand %p564_p5, %p175_p7  ;;  %s187_s27 = sshll.u32 %s902_s26, 4  ;;  %s188_s27 = int_to_ptr.vmem [resolvable:$true] %s187_s27 }
  0x11   : > { %s37_s29 = sadd.s32 1, %s896_s19  ;;  %s696_s6 = scalar_lea.hbm %s1237_s1, 512 }
  0x12   : > { %s1246_s25 = scalar_select %p991_p8, 1, 0 }
  0x13   : > { %p618_p9 = pneg %p991_p8  ;;  %p697_p12 = scmp.ne.s32.totalorder %s1237_s1, %s696_s6 }
  0x14   : > { %p703_p5 = scmp.lt.u32.totalorder %s696_s6, %s1237_s1 }
  0x15   : > { %p1000_p11 = pnand %p618_p9, %p1241_p1 }
  0x17   : > { %p698_p13 = pneg %p1000_p11 }
  0x19   : > { %p699_p0 = pnand %p698_p13, %p697_p12 }
  0x1b   : > { %p700_p3 = pneg %p699_p0 }
  0x1d   : > { %p705_p7 = pnand %p703_p5, %p700_p3 }
  0x1f   : > { %708 = shalt.err (!%p705_p7)
}
  0x20   : > { %s709_s11 = scalar_lea.vmem %s188_s27, 512  ;;  %p717_p2 = scmp.lt.s32.totalorder %s188_s27, %s188_s27 }
  0x21   : > { %p710_p9 = scmp.ne.s32.totalorder %s188_s27, %s709_s11  ;;  %p718_p6 = scmp.lt.s32.totalorder %s709_s11, %s709_s11 }
  0x23   : > { %p712_p10 = pnand %p710_p9, %p698_p13  ;;  %p719_p4 = por %p718_p6, %p717_p2 }
  0x25   : > { %p713_p1 = pneg %p712_p10 }
  0x27   : > { %p720_p8 = pnand %p719_p4, %p713_p1 }
  0x29   : > { %723 = shalt.err (!%p720_p8)
}
  0x2a   : > { %s903_s12 = smov 128   ;;  %s904_s13 = smov 8  }
  0x2b   : > { %621 = dma.hbm_to_vmem [thread:$0]  (!%p1000_p11), %s1237_s1, 512, %s188_s27, [#allocation6], %s903_s12, %s903_s12, %s904_s13  }
  0x2c   : > { %p39_p1 = scmp.ge.s32.totalorder %s37_s29, 2  ;;  %s46_s30 = sadd.s32 1, %s888_s17 }
  0x2d   : > { %p53_p2 = scmp.ne.s32.totalorder %s888_s17, %s884_s16  ;;  %p54_p4 = scmp.eq.s32.totalorder %s900_s20, 0 }
  0x2e   : > { %s1264_s29 = smov (%p39_p1, %s37_s29), 0  ;;  %p1249_p8 = scmp.eq.s32.totalorder %s970_s21, 1 }
  0x2f   : > { %p1027_p6 = por %p54_p4, %p53_p2  ;;  %s41_s28 = ssub.s32 %s896_s19, %s1264_s29 }
  0x30   : > { %p1033_p10 = por %p1249_p8, %p53_p2  ;;  %p637_p12 = scmp.lt.s32.totalorder %s900_s20, 2 }
  0x31   : > { %p44_p11 = scmp.eq.s32.totalorder %s41_s28, 0  ;;  %s201_s27 = sand.u32 1, %s888_s17  }
  0x32   : > { %s567_s7 = sshll.u32 %s201_s27, 3  ;;  %s568_s9 = sshll.u32 %s896_s19, 7 }
  0x33   : > { %s1042_s8 = scalar_select %p44_p11, %s888_s17, %s46_s30  }
  0x34   : > { %s1048_s12 = scalar_lea.hbm %s1236_s0, %s568_s9  ;;  %s205_s13 = scalar_lea.vmem [#allocation2], %s567_s7 }
  0x35   : > { %s213_s14 = sshll.u32 %s205_s13, 4  ;;  %p1054_p13 = pnand %p637_p12, %p1027_p6  ;;  %s1050_s14 = int_to_ptr.vmem [resolvable:$true] %s213_s14 }
  0x36   : > { %s202_s30 = scalar_lea.sflag [#allocation3], %s201_s27  ;;  %s724_s28 = scalar_lea.hbm %s1048_s12, 128 }
  0x37   : > { %p725_p0 = scmp.ne.s32.totalorder %s1048_s12, %s724_s28  ;;  %p726_p3 = pneg %p1054_p13 }
  0x38   : > { %s729_s10 = scalar_lea.hbm %s1236_s0, 256  ;;  %p730_p9 = scmp.lt.u32.totalorder %s1048_s12, %s1236_s0 }
  0x39   : > { %p727_p5 = pnand %p726_p3, %p725_p0  ;;  %p731_p1 = scmp.lt.u32.totalorder %s729_s10, %s724_s28 }
  0x3a   : > { %p733_p4 = scmp.lt.u32.totalorder %s724_s28, %s1048_s12 }
  0x3b   : > { %p728_p7 = pneg %p727_p5  ;;  %p732_p2 = por %p731_p1, %p730_p9 }
  0x3d   : > { %p734_p6 = por %p733_p4, %p732_p2 }
  0x3f   : > { %p735_p8 = pnand %p734_p6, %p728_p7 }
  0x41   : > { %738 = shalt.err (!%p735_p8)
}
  0x42   : > { %s739_s27 = scalar_lea.vmem %s1050_s14, 128  ;;  %s905_s13 = smov [#allocation2]  }
  0x43   : > { %p740_p12 = scmp.ne.s32.totalorder %s1050_s14, %s739_s27  ;;  %s744_s7 = sshll.u32 %s905_s13, 4  ;;  %s745_s7 = int_to_ptr.vmem [resolvable:$false] %s744_s7 }
  0x44   : > { %s746_s9 = scalar_lea.vmem %s745_s7, 256  ;;  %p747_p5 = scmp.lt.s32.totalorder %s1050_s14, %s745_s7 }
  0x45   : > { %p742_p11 = pnand %p740_p12, %p726_p3  ;;  %p748_p9 = scmp.lt.s32.totalorder %s746_s9, %s739_s27 }
  0x47   : > { %p743_p0 = pneg %p742_p11  ;;  %p749_p1 = por %p748_p9, %p747_p5 }
  0x49   : > { %p750_p2 = pnand %p749_p1, %p743_p0 }
  0x4b   : > { %753 = shalt.err (!%p750_p2)
}
  0x4c   : > { %625 = dma.hbm_to_vmem [thread:$0]  (!%p1054_p13), %s1048_s12, 128, %s1050_s14, %s202_s30  }
  0x4d   : > { %p1252_p7 = scmp.ne.s32.totalorder %s1246_s25, 0 }
  0x4e   : > { %s1086_s28 = sand.u32 (!%p1252_p7), 1, %s884_s16   ;;  %p1253_p3 = scmp.ne.s32.totalorder (!%p1252_p7), %s1244_s23, 0 }
  0x4f   : > { %222 = sbr.rel (%p1252_p7) target bundleno = 464 (0x1d0), region = 28  ;;  %s1089_s10 = sshll.u32 (!%p1252_p7), %s1086_s28, 3 }
  0x50   : > { %s225_s5 = scalar_lea.sflag (!%p1252_p7), [#allocation3], %s1086_s28  ;;  %s228_s11 = scalar_lea.vmem (!%p1252_p7), [#allocation2], %s1089_s10 }
  0x56   : > { %863 = dma.done.wait (%p1253_p3), %s225_s5, 128  }
  0x57   : > { %865 = vsyncadd (%p1253_p3), %s225_s5, 4294967168  ;;  %p1254_p13 = scmp.eq.s32.totalorder %s970_s21, 0 }
  0x59   : > { %867 = dma.done.wait (%p1254_p13), [#allocation6], 512   ;;  %p1255_p4 = pmov %p1254_p13 }
  0x5a   : > { %v906_v0 = vmov 0.0|0.0   ;;  %vm907_vm0 = vmmov 0   ;;  %v908_v1 = vmov 0.0   ;;  %v268_v2 = vld [vmem:[#allocation5] sm:$0xff]  ;;  %v269_v3 = vld [vmem:[#allocation5 + $0x8] sm:$0xff]  ;;  %v270_v4 = vld [vmem:[#allocation5 + $0x10] sm:$0xff] }
  0x5b   : > { %869 = vsyncadd (%p1255_p4), [#allocation6], 4294966784  ;;  %600 = vmatprep.subr.bf16.mxu0 %v906_v0  ;;  %597 = vmatprep.mubr.msk.f32.mxu0 %vm907_vm0, %v908_v1  ;;  %v601_v5 = vpack.c.bf16 %v269_v3, %v268_v2  ;;  %v271_v6 = vld [vmem:[#allocation5 + $0x18] sm:$0xff]  ;;  %vm272_vm1 = vcmask 261120   ;;  %s1103_s23 = sshll.u32 %s892_s18, 7  ;;  %s252_s25 = scalar_lea.vmem [#allocation7], %s1089_s10 }
  0x5c   : > { %v604_v7 = vpack.c.bf16 %v271_v6, %v270_v4  ;;  %v267_v8 = vld [vmem:[%s228_s11] sm:$0xff]  ;;  %s381_s12 = sshll.u32 %s252_s25, 4  ;;  %s1110_s30 = scalar_lea.hbm %s1238_s2, %s1103_s23  ;;  %s1112_s12 = int_to_ptr.vmem [resolvable:$true] %s381_s12 }
  0x5d   : > { %602 = vmatpush3.bf16.msra.mxu0 %v601_v5  ;;  %s909_s27 = smov 96   ;;  %s357_s18 = scalar_lea.sflag [#allocation4], %s1086_s28 }
  0x5e   : > { %603 = vmatprep.subr.bf16.mxu0 %v906_v0  ;;  %s754_s13 = scalar_lea.vmem %s1112_s12, 128  ;;  %s910_s7 = smov [#allocation7]  }
  0x5f   : > { %p755_p6 = scmp.ne.s32.totalorder %s1112_s12, %s754_s13  ;;  %s758_s9 = sshll.u32 %s910_s7, 4  ;;  %s759_s9 = int_to_ptr.vmem [resolvable:$false] %s758_s9 }
  0x60   : > { %s760_s5 = scalar_lea.vmem %s759_s9, 256  ;;  %p761_p11 = scmp.lt.s32.totalorder %s1112_s12, %s759_s9 }
  0x61   : > { %605 = vmatpush3.bf16.msra.mxu0 %v604_v7  ;;  %p756_p8 = pnand %p755_p6, %p1033_p10  ;;  %p762_p0 = scmp.lt.s32.totalorder %s760_s5, %s754_s13 }
  0x63   : > { %p757_p12 = pneg %p756_p8  ;;  %p763_p5 = por %p762_p0, %p761_p11 }
  0x64   : > { %598 = vmatmul.mubr.msk.f32.vlgmr.msra.gmra.mrb[0].mxu0 %vm272_vm1, %v267_v8 }
  0x65   : > { %p764_p9 = pnand %p763_p5, %p757_p12 }
 0x137   : > { %v342_v9 = vpop.f32.mrb[0].mxu0 }
 0x138   : > { %346 = vst.msk [vmem:[%s252_s25] sm:$0xff] %vm272_vm1, %v342_v9  ;;  %348 = vrot.lane.b32.xlu0 %v342_v9, %s909_s27  ;;  %v599_v10 = vpop.f32.mrb[1].mxu0 }
 0x139   : > { %767 = shalt.err (!%p764_p9)
}
 0x13a   : > { %s768_s28 = scalar_lea.hbm %s1110_s30, 128  ;;  %s772_s14 = scalar_lea.hbm %s1238_s2, 256 }
 0x13b   : > { %p769_p1 = scmp.ne.s32.totalorder %s1110_s30, %s768_s28  ;;  %p773_p3 = scmp.lt.u32.totalorder %s1110_s30, %s1238_s2 }
 0x13c   : > { %p774_p13 = scmp.lt.u32.totalorder %s772_s14, %s768_s28  ;;  %p776_p6 = scmp.lt.u32.totalorder %s768_s28, %s1110_s30 }
 0x13d   : > { %p770_p2 = pnand %p769_p1, %p1033_p10 }
 0x13e   : > { %p775_p4 = por %p774_p13, %p773_p3 }
 0x13f   : > { %p771_p7 = pneg %p770_p2 }
 0x140   : > { %p777_p8 = por %p776_p6, %p775_p4 }
 0x142   : > { %p778_p12 = pnand %p777_p8, %p771_p7 }
 0x144   : > { %781 = shalt.err (!%p778_p12)
}
 0x145   : > { %612 = dma.vmem_to_hbm [thread:$0]  (%p1033_p10), %s1112_s12, 128, %s1110_s30, %s357_s18  }
 0x146   : > { %s911_s13 = smov 64   ;;  %s361_s7 = sand.u32 1, %s970_s21  }
 0x147   : > { %352 = vrot.lane.b32.xlu0 %v342_v9, %s911_s13  ;;  %s259_s9 = scalar_lea.vmem [#allocation8], %s1089_s10  ;;  %s1143_s25 = scalar_lea.hbm %s1239_s3, %s1103_s23 }
 0x148   : > { %s395_s5 = sshll.u32 %s259_s9, 4  ;;  %s266_s14 = scalar_lea.vmem [#allocation10], %s1089_s10  ;;  %s1145_s5 = int_to_ptr.vmem [resolvable:$true] %s395_s5 }
 0x149   : > { %s1150_s26 = sshll.u32 %s266_s14, 4  ;;  %s1153_s21 = scalar_lea.sflag [#allocation9], %s361_s7  ;;  %s1184_s26 = int_to_ptr.vmem [resolvable:$true] %s1150_s26 }
 0x14a   : > { %s782_s12 = scalar_lea.vmem %s1145_s5, 128  ;;  %s912_s30 = smov [#allocation8]  }
 0x14b   : > { %p783_p11 = scmp.ne.s32.totalorder %s1145_s5, %s782_s12  ;;  %s786_s18 = sshll.u32 %s912_s30, 4  ;;  %s787_s18 = int_to_ptr.vmem [resolvable:$false] %s786_s18 }
 0x14c   : > { %s788_s27 = scalar_lea.vmem %s787_s18, 256  ;;  %p789_p9 = scmp.lt.s32.totalorder %s1145_s5, %s787_s18 }
 0x14d   : > { %p784_p0 = pnand %p783_p11, %p1033_p10  ;;  %p790_p1 = scmp.lt.s32.totalorder %s788_s27, %s782_s12 }
 0x14f   : > { %p785_p5 = pneg %p784_p0  ;;  %p791_p2 = por %p790_p1, %p789_p9 }
 0x151   : > { %p792_p7 = pnand %p791_p2, %p785_p5 }
 0x1aa   : > { %v349_v11 = vpop.permute.xlu0 %348 }
 0x1ab   : > { %351 = vst.msk [vmem:[%s259_s9] sm:$0xff] %vm272_vm1, %v349_v11 }
 0x1ac   : > { %795 = shalt.err (!%p792_p7)
}
 0x1ad   : > { %s796_s13 = scalar_lea.hbm %s1143_s25, 128  ;;  %s800_s28 = scalar_lea.hbm %s1239_s3, 256 }
 0x1ae   : > { %p797_p3 = scmp.ne.s32.totalorder %s1143_s25, %s796_s13  ;;  %p801_p6 = scmp.lt.u32.totalorder %s1143_s25, %s1239_s3 }
 0x1af   : > { %p802_p8 = scmp.lt.u32.totalorder %s800_s28, %s796_s13  ;;  %p804_p11 = scmp.lt.u32.totalorder %s796_s13, %s1143_s25 }
 0x1b0   : > { %p798_p13 = pnand %p797_p3, %p1033_p10 }
 0x1b1   : > { %p803_p12 = por %p802_p8, %p801_p6 }
 0x1b2   : > { %p799_p4 = pneg %p798_p13 }
 0x1b3   : > { %p805_p0 = por %p804_p11, %p803_p12 }
 0x1b5   : > { %p806_p5 = pnand %p805_p0, %p799_p4 }
 0x1b7   : > { %809 = shalt.err (!%p806_p5)
}
 0x1b8   : > { %613 = dma.vmem_to_hbm [thread:$0]  (%p1033_p10), %s1145_s5, 128, %s1143_s25, %s1153_s21  }
 0x1b9   : > { %s1181_s27 = scalar_lea.hbm %s1240_s4, %s1103_s23  ;;  %v353_v12 = vpop.permute.xlu0 %352  ;;  %s810_s13 = scalar_lea.vmem %s1184_s26, 128 }
 0x1ba   : > { %355 = vst.msk [vmem:[%s266_s14] sm:$0xff] %vm272_vm1, %v353_v12  ;;  %p811_p9 = scmp.ne.s32.totalorder %s1184_s26, %s810_s13  ;;  %s913_s5 = smov [#allocation10]  }
 0x1bb   : > { %s814_s25 = sshll.u32 %s913_s5, 4  ;;  %s815_s25 = int_to_ptr.vmem [resolvable:$false] %s814_s25 }
 0x1bc   : > { %p812_p1 = pnand %p811_p9, %p1033_p10  ;;  %s816_s7 = scalar_lea.vmem %s815_s25, 256 }
 0x1bd   : > { %p817_p7 = scmp.lt.s32.totalorder %s1184_s26, %s815_s25  ;;  %p818_p3 = scmp.lt.s32.totalorder %s816_s7, %s810_s13 }
 0x1be   : > { %p813_p2 = pneg %p812_p1 }
 0x1bf   : > { %p819_p13 = por %p818_p3, %p817_p7 }
 0x1c1   : > { %p820_p4 = pnand %p819_p13, %p813_p2 }
 0x1c3   : > { %823 = shalt.err (!%p820_p4)
}
 0x1c4   : > { %s824_s10 = scalar_lea.hbm %s1181_s27, 128  ;;  %s828_s9 = scalar_lea.hbm %s1240_s4, 256 }
 0x1c5   : > { %p825_p6 = scmp.ne.s32.totalorder %s1181_s27, %s824_s10  ;;  %p829_p11 = scmp.lt.u32.totalorder %s1181_s27, %s1240_s4 }
 0x1c6   : > { %p830_p0 = scmp.lt.u32.totalorder %s828_s9, %s824_s10  ;;  %p832_p9 = scmp.lt.u32.totalorder %s824_s10, %s1181_s27 }
 0x1c7   : > { %p826_p8 = pnand %p825_p6, %p1033_p10 }
 0x1c8   : > { %p831_p5 = por %p830_p0, %p829_p11 }
 0x1c9   : > { %p827_p12 = pneg %p826_p8 }
 0x1ca   : > { %p833_p1 = por %p832_p9, %p831_p5 }
 0x1cc   : > { %p834_p2 = pnand %p833_p1, %p827_p12 }
 0x1ce   : > { %837 = shalt.err (!%p834_p2)
}
 0x1cf   : > { %614 = dma.vmem_to_hbm [thread:$0]  (%p1033_p10), %s1184_s26, 128, %s1181_s27, %s1153_s21  }
 0x1d0 PF: > { %s421_s30 = sand.u32 1, %s880_s15   ;;  %p1256_p7 = scmp.ne.s32.totalorder %s1245_s24, 0 }
 0x1d1   : > { %p1257_p3 = scmp.ge.s32.totalorder %s900_s20, 2  ;;  %s422_s12 = scalar_lea.sflag [#allocation4], %s421_s30 }
 0x1d3   : > { %p627_p13 = pnand %p1257_p3, %p1256_p7 }
 0x1d5   : > { %871 = dma.done.wait (!%p627_p13), %s422_s12, 128  }
 0x1d6   : > { %873 = vsyncadd (!%p627_p13), %s422_s12, 4294967168  ;;  %s430_s18 = sand.u32 1, %s563_s22  }
 0x1d7   : > { %s431_s13 = scalar_lea.sflag [#allocation9], %s430_s18 }
 0x1d8   : > { %875 = dma.done.wait (!%p627_p13), %s431_s13, 256  }
 0x1d9   : > { %877 = vsyncadd (!%p627_p13), %s431_s13, 4294967040  ;;  %s25_s20 = sadd.s32 1, %s900_s20   ;;  %s1258_s15 = smov %s884_s16 }
 0x1da   : > { %p22_p10 = scmp.ge.s32.totalorder %s25_s20, 4   ;;  %s1259_s16 = smov %s888_s17 }
 0x1db   : > { %s1260_s17 = smov %s1042_s8  ;;  %s1261_s18 = smov %s896_s19 }
 0x1dc   : > { %s1262_s19 = smov %s1264_s29  ;;  %24 = sbr.rel (!%p22_p10) target bundleno = 9 (0x9), region = 109 }
 0x1e3   :  { %445 = vsyncpa [#allocation3], 1 }
 0x1e4   :  { %447 = vsyncpa [#allocation3 + $0x1], 1 }
 0x1e5   :  { %448 = vsyncpa [#allocation6], 1 }
 0x1e6   :  { %449 = vsyncpa [#allocation4], 1 }
 0x1e7   :  { %451 = vsyncpa [#allocation4 + $0x1], 1 }
 0x1e8   :  { %452 = vsyncpa [#allocation9], 1 }
 0x1e9   :  { %454 = vsyncpa [#allocation9 + $0x1], 1 }

</bundles_post_ra>
